<compile_context>
chip_gen: v7x
topology: tpu7x:2x2x1
jax: 0.10.0
libtpu: 0.0.40
codegen_flags: <defaults>
</compile_context>

<pallas_src>
import functools

import jax
import jax.numpy as jnp
from jax.experimental import pallas as pl
from jax.experimental.pallas import tpu as pltpu

_LANE = 128


def _round_up(v, m):
    return (v + m - 1) // m * m


def _tpu_vmem_capacity_bytes():
    try:
        return int(pltpu.get_tpu_info().vmem_capacity_bytes)
    except Exception:
        return 128 * 2**20  # v5e/v6e default if the query is unavailable


# ----------------------------------------------------------------------------
# Fused MLP kernel: all linear layers chained inside one kernel invocation.
# Intermediate activations live in VMEM/vregs and never round-trip HBM.
# ----------------------------------------------------------------------------
def _ffn_fused_kernel(x_ref, *rest, n_linear, activation, bf16_epilogue):
    """x_ref: (TM, K) compute dtype; rest = w0, b0, ..., w_{L-1}, b_{L-1}, o_ref.

    w_l: (K_l, N_l) compute dtype, b_l: (1, N_l) f32, o_ref: (TM, N_last).
    MXU dots accumulate in f32; bias + activation ride the VPU/EUP epilogue.
    """
    o_ref = rest[-1]
    h = x_ref[...]
    for li in range(n_linear):
        w_ref = rest[2 * li]
        b_ref = rest[2 * li + 1]
        acc = jnp.dot(h, w_ref[...], preferred_element_type=jnp.float32)
        acc = acc + b_ref[...]  # f32 bias add
        if li < n_linear - 1:
            if activation == "relu":
                h = jnp.maximum(acc, 0.0).astype(w_ref.dtype)  # f32 VPU (v5e-safe)
            else:
                if bf16_epilogue:
                    # bf16 EUP tanh on v6e/v7x; next layer needs bf16 anyway.
                    h = jnp.tanh(acc.astype(jnp.bfloat16))
                else:
                    h = jnp.tanh(acc).astype(w_ref.dtype)
        else:
            o_ref[...] = acc.astype(o_ref.dtype)


# ----------------------------------------------------------------------------
# One-time parameter preparation (padding + dtype cast hoisted out of forward)
# ----------------------------------------------------------------------------
def prepare_ffn_params(params, compute_dtype=jnp.float32, vmem_capacity_bytes=None):
    """Pad the lane (output) dims to multiples of 128 and cast once.

    params: list of (w, b) with w: (fan_in, fan_out), b: (fan_out,) float32.
    The first layer's contraction dim (n_features) is deliberately NOT padded.
    Returns (padded_params, n_classes, compute_dtype_used).
    """
    if vmem_capacity_bytes is None:
        vmem_capacity_bytes = _tpu_vmem_capacity_bytes()

    n_features = params[0][0].shape[0]
    n_classes = params[-1][0].shape[1]

    cdtype = jnp.dtype(compute_dtype)

    # Estimate the padded resident weight footprint; Pallas double-buffers inputs
    # by default, so count 2x.  If f32 weights would blow ~40% of VMEM (v7x
    # 64 MiB case), fall back to bf16 weights automatically.
    def _padded_weight_bytes(itemsize):
        total, in_d = 0, n_features
        for (w, _b) in params:
            fout_pad = _round_up(w.shape[1], _LANE)
            total += in_d * fout_pad * itemsize + fout_pad * 4
            in_d = fout_pad
        return total

    if cdtype == jnp.dtype(jnp.float32):
        if 2 * _padded_weight_bytes(4) > 0.4 * vmem_capacity_bytes:
            cdtype = jnp.dtype(jnp.bfloat16)
            # TODO(synk): stream layers (grid axis over layers / emit_pipeline)
            # instead of forcing bf16 when even bf16-resident weights do not fit.

    padded = []
    in_dim = n_features  # first contraction dim stays unpadded
    for (w, b) in params:
        fin, fout = w.shape
        fout_pad = _round_up(fout, _LANE)
        w_p = jnp.pad(w, ((0, in_dim - fin), (0, fout_pad - fout))).astype(cdtype)
        b_p = jnp.pad(b, (0, fout_pad - fout)).reshape(1, fout_pad).astype(jnp.float32)
        padded.append((w_p, b_p))
        in_dim = fout_pad

    return tuple(padded), n_classes, cdtype


# ----------------------------------------------------------------------------
# Forward pass: single fused pallas_call, batch tiled over the grid
# ----------------------------------------------------------------------------
def ffn_apply(prepared, x, activation_type="relu", *, block_m=None,
              out_dtype=jnp.float32):
    padded, n_classes, cdtype = prepared
    act = "relu" if activation_type == "relu" else "tanh"

    M, K = x.shape
    n_linear = len(padded)
    c_pad = padded[-1][0].shape[1]
    itemsize = jnp.dtype(cdtype).itemsize
    out_itemsize = jnp.dtype(out_dtype).itemsize

    vmem_cap = _tpu_vmem_capacity_bytes()
    if block_m is None:
        # v7x (64 MiB / TC): medium tiles so both TensorCores get work within
        # budget; v5e/v6e (128 MiB): big tiles to amortize per-grid-step cost.
        block_m = 256 if vmem_cap <= 64 * 2**20 else 512

    row_align = 16 if itemsize == 2 else 8  # bf16 packs 2 rows per sublane
    tm = min(_round_up(block_m, row_align), _round_up(M, row_align))
    grid = (pl.cdiv(M, tm),)  # ragged last tile handled by Pallas (no pad copy)

    x_c = x.astype(cdtype)

    # ---- specs: x/out tiled over batch; weights/biases VMEM-resident
    in_specs = [pl.BlockSpec((tm, K), lambda i: (i, 0))]
    operands = [x_c]
    for (w_p, b_p) in padded:
        kw, nw = w_p.shape
        in_specs.append(pl.BlockSpec((kw, nw), lambda i: (0, 0)))
        in_specs.append(pl.BlockSpec((1, nw), lambda i: (0, 0)))
        operands.extend([w_p, b_p])
    out_specs = pl.BlockSpec((tm, c_pad), lambda i: (i, 0))

    # ---- VMEM budget: weights counted double-buffered (Pallas default), plus
    # double-buffered x/out tiles and the f32 intermediate; capped below the
    # physical per-core capacity (v7x = 64 MiB).
    weight_bytes = sum(w.size * itemsize + b.size * 4 for w, b in padded)
    resident_bytes = 2 * weight_bytes
    tile_bytes = 2 * tm * K * itemsize + 2 * tm * c_pad * out_itemsize
    h_bytes = 2 * tm * max(w.shape[1] for w, _ in padded) * 4
    budget = resident_bytes + tile_bytes + h_bytes
    vmem_limit = int(min(0.75 * vmem_cap, max(32 * 2**20, 1.5 * budget)))

    flops = 2 * M * sum(w.shape[0] * w.shape[1] for w, _ in padded)
    transcendentals = (M * sum(w.shape[1] for w, _ in padded[:-1])
                       if act == "tanh" else 0)
    bytes_accessed = (x_c.size * itemsize + weight_bytes + M * c_pad * out_itemsize)

    kernel = functools.partial(
        _ffn_fused_kernel,
        n_linear=n_linear,
        activation=act,
        bf16_epilogue=(jnp.dtype(cdtype) == jnp.dtype(jnp.bfloat16)),
    )

    out_pad = pl.pallas_call(
        kernel,
        out_shape=jax.ShapeDtypeStruct((M, c_pad), out_dtype),
        grid=grid,
        in_specs=in_specs,
        out_specs=out_specs,
        compiler_params=pltpu.CompilerParams(
            dimension_semantics=("parallel",),
            vmem_limit_bytes=vmem_limit,
        ),
        cost_estimate=pl.CostEstimate(
            flops=int(flops),
            transcendentals=int(transcendentals),
            bytes_accessed=int(bytes_accessed),
        ),
    )(*operands)

    return out_pad[:, :n_classes]


def ffn_forward(params, x, activation_type="relu", *, compute_dtype=jnp.float32,
                block_m=None, out_dtype=jnp.float32):
    """Convenience wrapper: prepare (pad/cast) params then apply.

    For serving, call prepare_ffn_params() once and reuse it with ffn_apply().
    """
    prepared = prepare_ffn_params(params, compute_dtype)
    return ffn_apply(prepared, x, activation_type, block_m=block_m,
                     out_dtype=out_dtype)


# ----------------------------------------------------------------------------
# Parameter init (mimics nn.Linear default U(-1/sqrt(fan_in), 1/sqrt(fan_in)))
# ----------------------------------------------------------------------------
def init_ffn_params(key, n_classes, n_features, hidden_size, layers):
    params = []

    def make_linear_params(k, fan_in, fan_out):
        kw, kb = jax.random.split(k)
        bound = 1.0 / jnp.sqrt(jnp.float32(fan_in))
        w = jax.random.uniform(kw, (fan_in, fan_out), jnp.float32, -bound, bound)
        b = jax.random.uniform(kb, (fan_out,), jnp.float32, -bound, bound)
        return w, b

    keys = jax.random.split(key, layers + 1)
    params.append(make_linear_params(keys[0], n_features, hidden_size))
    for i in range(layers - 1):
        params.append(make_linear_params(keys[1 + i], hidden_size, hidden_size))
    params.append(make_linear_params(keys[layers], hidden_size, n_classes))
    return params


# ----------------------------------------------------------------------------
# Pure-JAX reference
# ----------------------------------------------------------------------------
def ffn_forward_ref(params, x, activation_type="relu"):
    act_fn = (lambda v: jnp.maximum(v, 0.0)) if activation_type == "relu" else jnp.tanh
    w, b = params[0]
    h = act_fn(x @ w + b)
    for w, b in params[1:-1]:
        h = act_fn(h @ w + b)
    w, b = params[-1]
    return h @ w + b


if __name__ == "__main__":
    batch = 8
    n_features = 32
    hidden_size = 64
    layers = 3          # first layer + 2 hidden layers + output layer
    n_classes = 10

    key = jax.random.PRNGKey(0)
    key_x, key_p, key_x2 = jax.random.split(key, 3)

    x = jax.random.normal(key_x, (batch, n_features), jnp.float32)
    params = init_ffn_params(key_p, n_classes, n_features, hidden_size, layers)

    # f32 / relu (one-shot convenience path)
    out = jax.block_until_ready(ffn_forward(params, x, "relu"))
    ref = ffn_forward_ref(params, x, "relu")
    assert out.shape == (batch, n_classes)
    assert jnp.allclose(out, ref, atol=1e-5, rtol=1e-5), "relu f32 mismatch"

    # f32 / tanh
    out_t = jax.block_until_ready(ffn_forward(params, x, "tanh"))
    ref_t = ffn_forward_ref(params, x, "tanh")
    assert jnp.allclose(out_t, ref_t, atol=1e-5, rtol=1e-5), "tanh f32 mismatch"

    # Serving-style path: params padded/cast ONCE, apply jitted and reused.
    prepared = prepare_ffn_params(params, jnp.float32)
    apply_jit = jax.jit(lambda xx: ffn_apply(prepared, xx, "relu"))

    out_j = jax.block_until_ready(apply_jit(x))
    assert jnp.allclose(out_j, ref, atol=1e-5, rtol=1e-5), "jit relu f32 mismatch"

    # Larger, non-aligned batch exercises the ragged-tile path (no batch pad copy)
    x2 = jax.random.normal(key_x2, (300, n_features), jnp.float32)
    out2 = jax.block_until_ready(jax.jit(lambda xx: ffn_apply(prepared, xx, "relu"))(x2))
    ref2 = ffn_forward_ref(params, x2, "relu")
    assert out2.shape == (300, n_classes)
    assert jnp.allclose(out2, ref2, atol=1e-5, rtol=1e-5), "ragged relu f32 mismatch"

    # bf16 operands with f32 accumulation (bandwidth path on v5e/v6e/v7x)
    prepared_bf16 = prepare_ffn_params(params, jnp.bfloat16)
    out_bf16 = jax.block_until_ready(ffn_apply(prepared_bf16, x, "relu"))
    assert jnp.allclose(out_bf16, ref, atol=1e-1, rtol=1e-1), "bf16 relu mismatch"
    out_bf16_t = jax.block_until_ready(ffn_apply(prepared_bf16, x, "tanh"))
    assert jnp.allclose(out_bf16_t, ref_t, atol=1e-1, rtol=1e-1), "bf16 tanh mismatch"

    print("KERNEL_OK")
</pallas_src>

<mosaic_0001>
module attributes {stable_mosaic.version = 11 : i64} {
  func.func @_ffn_fused_kernel(%arg0: i32, %arg1: memref<8x32xf32, #tpu.memory_space<vmem>>, %arg2: memref<32x128xf32, #tpu.memory_space<vmem>>, %arg3: memref<1x128xf32, #tpu.memory_space<vmem>>, %arg4: memref<128x128xf32, #tpu.memory_space<vmem>>, %arg5: memref<1x128xf32, #tpu.memory_space<vmem>>, %arg6: memref<128x128xf32, #tpu.memory_space<vmem>>, %arg7: memref<1x128xf32, #tpu.memory_space<vmem>>, %arg8: memref<128x128xf32, #tpu.memory_space<vmem>>, %arg9: memref<1x128xf32, #tpu.memory_space<vmem>>, %arg10: memref<8x128xf32, #tpu.memory_space<vmem>>) attributes {dimension_semantics = [#tpu.dimension_semantics<parallel>], iteration_bounds = array<i64: 1>, scalar_prefetch = 0 : i64, scratch_operands = 0 : i64, tpu.core_type = #tpu.core_type<tc>, window_params = [{transform_indices = @transform_0, window_bounds = array<i64: 8, 32>}, {pipeline_mode = #tpu.pipeline_mode<synchronous>, transform_indices = @transform_1, window_bounds = array<i64: 32, 128>}, {pipeline_mode = #tpu.pipeline_mode<synchronous>, transform_indices = @transform_2, window_bounds = array<i64: 1, 128>}, {pipeline_mode = #tpu.pipeline_mode<synchronous>, transform_indices = @transform_3, window_bounds = array<i64: 128, 128>}, {pipeline_mode = #tpu.pipeline_mode<synchronous>, transform_indices = @transform_4, window_bounds = array<i64: 1, 128>}, {pipeline_mode = #tpu.pipeline_mode<synchronous>, transform_indices = @transform_5, window_bounds = array<i64: 128, 128>}, {pipeline_mode = #tpu.pipeline_mode<synchronous>, transform_indices = @transform_6, window_bounds = array<i64: 1, 128>}, {pipeline_mode = #tpu.pipeline_mode<synchronous>, transform_indices = @transform_7, window_bounds = array<i64: 128, 128>}, {pipeline_mode = #tpu.pipeline_mode<synchronous>, transform_indices = @transform_8, window_bounds = array<i64: 1, 128>}, {transform_indices = @transform_9, window_bounds = array<i64: 8, 128>}]} {
    %c0 = arith.constant 0 : index
    %c0_0 = arith.constant 0 : index
    %0 = vector.load %arg1[%c0, %c0_0] : memref<8x32xf32, #tpu.memory_space<vmem>>, vector<8x32xf32>
    %c0_1 = arith.constant 0 : index
    %c0_2 = arith.constant 0 : index
    %1 = vector.load %arg2[%c0_1, %c0_2] : memref<32x128xf32, #tpu.memory_space<vmem>>, vector<32x128xf32>
    %cst = arith.constant dense<0.000000e+00> : vector<8x128xf32>
    %2 = tpu.matmul %0, %1, %cst {dimension_numbers = #tpu.dot_dimension_numbers<[1], [0], [0], [1], [0, 0, 1, 1], [], []>} : vector<8x32xf32>, vector<32x128xf32>, vector<8x128xf32> -> vector<8x128xf32>
    %c0_3 = arith.constant 0 : index
    %c0_4 = arith.constant 0 : index
    %3 = vector.load %arg3[%c0_3, %c0_4] : memref<1x128xf32, #tpu.memory_space<vmem>>, vector<1x128xf32>
    %4 = vector.broadcast %3 : vector<1x128xf32> to vector<8x128xf32>
    %5 = arith.addf %2, %4 : vector<8x128xf32>
    %cst_5 = arith.constant 0.000000e+00 : f32
    %6 = vector.broadcast %cst_5 : f32 to vector<8x128xf32>
    %7 = arith.maximumf %5, %6 : vector<8x128xf32>
    %c0_6 = arith.constant 0 : index
    %c0_7 = arith.constant 0 : index
    %8 = vector.load %arg4[%c0_6, %c0_7] : memref<128x128xf32, #tpu.memory_space<vmem>>, vector<128x128xf32>
    %cst_8 = arith.constant dense<0.000000e+00> : vector<8x128xf32>
    %9 = tpu.matmul %7, %8, %cst_8 {dimension_numbers = #tpu.dot_dimension_numbers<[1], [0], [0], [1], [0, 0, 1, 1], [], []>} : vector<8x128xf32>, vector<128x128xf32>, vector<8x128xf32> -> vector<8x128xf32>
    %c0_9 = arith.constant 0 : index
    %c0_10 = arith.constant 0 : index
    %10 = vector.load %arg5[%c0_9, %c0_10] : memref<1x128xf32, #tpu.memory_space<vmem>>, vector<1x128xf32>
    %11 = vector.broadcast %10 : vector<1x128xf32> to vector<8x128xf32>
    %12 = arith.addf %9, %11 : vector<8x128xf32>
    %cst_11 = arith.constant 0.000000e+00 : f32
    %13 = vector.broadcast %cst_11 : f32 to vector<8x128xf32>
    %14 = arith.maximumf %12, %13 : vector<8x128xf32>
    %c0_12 = arith.constant 0 : index
    %c0_13 = arith.constant 0 : index
    %15 = vector.load %arg6[%c0_12, %c0_13] : memref<128x128xf32, #tpu.memory_space<vmem>>, vector<128x128xf32>
    %cst_14 = arith.constant dense<0.000000e+00> : vector<8x128xf32>
    %16 = tpu.matmul %14, %15, %cst_14 {dimension_numbers = #tpu.dot_dimension_numbers<[1], [0], [0], [1], [0, 0, 1, 1], [], []>} : vector<8x128xf32>, vector<128x128xf32>, vector<8x128xf32> -> vector<8x128xf32>
    %c0_15 = arith.constant 0 : index
    %c0_16 = arith.constant 0 : index
    %17 = vector.load %arg7[%c0_15, %c0_16] : memref<1x128xf32, #tpu.memory_space<vmem>>, vector<1x128xf32>
    %18 = vector.broadcast %17 : vector<1x128xf32> to vector<8x128xf32>
    %19 = arith.addf %16, %18 : vector<8x128xf32>
    %cst_17 = arith.constant 0.000000e+00 : f32
    %20 = vector.broadcast %cst_17 : f32 to vector<8x128xf32>
    %21 = arith.maximumf %19, %20 : vector<8x128xf32>
    %c0_18 = arith.constant 0 : index
    %c0_19 = arith.constant 0 : index
    %22 = vector.load %arg8[%c0_18, %c0_19] : memref<128x128xf32, #tpu.memory_space<vmem>>, vector<128x128xf32>
    %cst_20 = arith.constant dense<0.000000e+00> : vector<8x128xf32>
    %23 = tpu.matmul %21, %22, %cst_20 {dimension_numbers = #tpu.dot_dimension_numbers<[1], [0], [0], [1], [0, 0, 1, 1], [], []>} : vector<8x128xf32>, vector<128x128xf32>, vector<8x128xf32> -> vector<8x128xf32>
    %c0_21 = arith.constant 0 : index
    %c0_22 = arith.constant 0 : index
    %24 = vector.load %arg9[%c0_21, %c0_22] : memref<1x128xf32, #tpu.memory_space<vmem>>, vector<1x128xf32>
    %25 = vector.broadcast %24 : vector<1x128xf32> to vector<8x128xf32>
    %26 = arith.addf %23, %25 : vector<8x128xf32>
    %c0_23 = arith.constant 0 : index
    %c0_24 = arith.constant 0 : index
    %27 = vector.load %arg10[%c0_23, %c0_24] : memref<8x128xf32, #tpu.memory_space<vmem>>, vector<8x128xf32>
    tpu.vector_store %arg10[%c0_23, %c0_24], %26 {strides = array<i32>} : memref<8x128xf32, #tpu.memory_space<vmem>>, vector<8x128xf32>,
    return
  }
  func.func @transform_0(%arg0: i32) -> (i32, i32) {
    %c0_i32 = arith.constant 0 : i32
    %c0_i32_0 = arith.constant 0 : i32
    return %arg0, %c0_i32 : i32, i32
  }
  func.func @transform_1(%arg0: i32) -> (i32, i32) {
    %c0_i32 = arith.constant 0 : i32
    %c0_i32_0 = arith.constant 0 : i32
    %c0_i32_1 = arith.constant 0 : i32
    return %c0_i32, %c0_i32_0 : i32, i32
  }
  func.func @transform_2(%arg0: i32) -> (i32, i32) {
    %c0_i32 = arith.constant 0 : i32
    %c0_i32_0 = arith.constant 0 : i32
    %c0_i32_1 = arith.constant 0 : i32
    return %c0_i32, %c0_i32_0 : i32, i32
  }
  func.func @transform_3(%arg0: i32) -> (i32, i32) {
    %c0_i32 = arith.constant 0 : i32
    %c0_i32_0 = arith.constant 0 : i32
    %c0_i32_1 = arith.constant 0 : i32
    return %c0_i32, %c0_i32_0 : i32, i32
  }
  func.func @transform_4(%arg0: i32) -> (i32, i32) {
    %c0_i32 = arith.constant 0 : i32
    %c0_i32_0 = arith.constant 0 : i32
    %c0_i32_1 = arith.constant 0 : i32
    return %c0_i32, %c0_i32_0 : i32, i32
  }
  func.func @transform_5(%arg0: i32) -> (i32, i32) {
    %c0_i32 = arith.constant 0 : i32
    %c0_i32_0 = arith.constant 0 : i32
    %c0_i32_1 = arith.constant 0 : i32
    return %c0_i32, %c0_i32_0 : i32, i32
  }
  func.func @transform_6(%arg0: i32) -> (i32, i32) {
    %c0_i32 = arith.constant 0 : i32
    %c0_i32_0 = arith.constant 0 : i32
    %c0_i32_1 = arith.constant 0 : i32
    return %c0_i32, %c0_i32_0 : i32, i32
  }
  func.func @transform_7(%arg0: i32) -> (i32, i32) {
    %c0_i32 = arith.constant 0 : i32
    %c0_i32_0 = arith.constant 0 : i32
    %c0_i32_1 = arith.constant 0 : i32
    return %c0_i32, %c0_i32_0 : i32, i32
  }
  func.func @transform_8(%arg0: i32) -> (i32, i32) {
    %c0_i32 = arith.constant 0 : i32
    %c0_i32_0 = arith.constant 0 : i32
    %c0_i32_1 = arith.constant 0 : i32
    return %c0_i32, %c0_i32_0 : i32, i32
  }
  func.func @transform_9(%arg0: i32) -> (i32, i32) {
    %c0_i32 = arith.constant 0 : i32
    %c0_i32_0 = arith.constant 0 : i32
    return %arg0, %c0_i32 : i32, i32
  }
}

</mosaic_0001>

<bundles_post_ra>
// kernel: tpu_custom_call.1
= control target key start
LH: loop header
LB: loop body
LE: loop exit
PB: predicated region body
PF: predicated region fallthrough
CT: control target
= control target key end

     0   :  { %14 = vsyncpa [#allocation3], 0  ;;  %s1082_s0 = inlined_call_operand.hbm [shape: f32[8,32], index: 0, kind: input, shape index: {}]   ;;  %s1083_s1 = inlined_call_operand.hbm [shape: f32[32,128], index: 1, kind: input, shape index: {}]   ;;  %s1084_s2 = inlined_call_operand.vmem [shape: f32[1,128], index: 2, kind: input, shape index: {}]   ;;  %s1085_s3 = inlined_call_operand.hbm [shape: f32[128,128], index: 3, kind: input, shape index: {}]   ;;  %s1086_s4 = inlined_call_operand.vmem [shape: f32[1,128], index: 4, kind: input, shape index: {}]   ;;  %s1087_s5 = inlined_call_operand.hbm [shape: f32[128,128], index: 5, kind: input, shape index: {}]   ;;  %s1088_s6 = inlined_call_operand.vmem [shape: f32[1,128], index: 6, kind: input, shape index: {}]   ;;  %s1089_s7 = inlined_call_operand.hbm [shape: f32[128,128], index: 7, kind: input, shape index: {}]   ;;  %s1090_s8 = inlined_call_operand.vmem [shape: f32[1,128], index: 8, kind: input, shape index: {}]   ;;  %s1091_s9 = inlined_call_operand.hbm [shape: f32[8,128], index: 9, kind: output, shape index: {}]  }
   0x1   :  { %15 = vsyncpa [#allocation6], 0 }
   0x2   :  { %16 = vsyncpa [#allocation9], 0 }
   0x3   :  { %17 = vsyncpa [#allocation4], 0  ;;  %s891_s30 = smov [#allocation5]   ;;  %s751_s13 = scalar_lea.hbm %s1083_s1, 512 }
   0x4   :  { %s33_s10 = sshll.u32 %s891_s30, 4  ;;  %p752_p0 = scmp.ne.s32.totalorder %s1083_s1, %s751_s13  ;;  %s34_s10 = int_to_ptr.vmem [resolvable:$true] %s33_s10 }
   0x5   :  { %p755_p1 = scmp.lt.u32.totalorder %s751_s13, %s1083_s1 }
   0x7   :  { %p757_p2 = pnand %p755_p1, %p752_p0 }
   0x9   :  { %760 = shalt.err (!%p757_p2)
}
   0xa   :  { %s761_s18 = scalar_lea.vmem %s34_s10, 512  ;;  %p766_p4 = scmp.lt.s32.totalorder %s34_s10, %s34_s10 }
   0xb   :  { %p762_p3 = scmp.ne.s32.totalorder %s34_s10, %s761_s18  ;;  %p767_p5 = scmp.lt.s32.totalorder %s761_s18, %s761_s18 }
   0xd   :  { %p768_p6 = por %p767_p5, %p766_p4 }
   0xf   :  { %p769_p7 = pnand %p768_p6, %p762_p3 }
  0x11   :  { %772 = shalt.err (!%p769_p7)
}
  0x12   :  { %s892_s19 = smov 128   ;;  %s893_s20 = smov 8  }
  0x13   :  { %39 = dma.hbm_to_vmem [thread:$0]  %s1083_s1, 512, %s34_s10, [#allocation6], %s892_s19, %s892_s19, %s893_s20  }
  0x14   :  { %s894_s23 = smov [#allocation8]   ;;  %s895_s25 = smov [#allocation2]  }
  0x15   :  { %s61_s24 = sshll.u32 %s894_s23, 4  ;;  %s24_s26 = sshll.u32 %s895_s25, 4  ;;  %s62_s24 = int_to_ptr.vmem [resolvable:$true] %s61_s24  ;;  %s25_s26 = int_to_ptr.vmem [resolvable:$true] %s24_s26 }
  0x16   :  { %s773_s29 = scalar_lea.hbm %s1087_s5, 2048 }
  0x17   :  { %p774_p8 = scmp.ne.s32.totalorder %s1087_s5, %s773_s29  ;;  %p777_p9 = scmp.lt.u32.totalorder %s773_s29, %s1087_s5 }
  0x19   :  { %p779_p10 = pnand %p777_p9, %p774_p8 }
  0x1b   :  { %782 = shalt.err (!%p779_p10)
}
  0x1c   :  { %s783_s1 = scalar_lea.vmem %s62_s24, 2048  ;;  %p788_p12 = scmp.lt.s32.totalorder %s62_s24, %s62_s24 }
  0x1d   :  { %p784_p11 = scmp.ne.s32.totalorder %s62_s24, %s783_s1  ;;  %p789_p13 = scmp.lt.s32.totalorder %s783_s1, %s783_s1 }
  0x1f   :  { %p790_p0 = por %p789_p13, %p788_p12 }
  0x21   :  { %p791_p1 = pnand %p790_p0, %p784_p11 }
  0x23   :  { %794 = shalt.err (!%p791_p1)
}
  0x24   :  { %67 = dma.hbm_to_vmem [thread:$0]  %s1087_s5, 2048, %s62_s24, [#allocation9], %s892_s19, %s892_s19, %s893_s20  }
  0x25   :  { %s795_s17 = scalar_lea.hbm %s1082_s0, 128 }
  0x26   :  { %p796_p2 = scmp.ne.s32.totalorder %s1082_s0, %s795_s17  ;;  %p799_p3 = scmp.lt.u32.totalorder %s795_s17, %s1082_s0 }
  0x28   :  { %p801_p4 = pnand %p799_p3, %p796_p2 }
  0x2a   :  { %804 = shalt.err (!%p801_p4)
}
  0x2b   :  { %s805_s25 = scalar_lea.vmem %s25_s26, 128  ;;  %p810_p6 = scmp.lt.s32.totalorder %s25_s26, %s25_s26 }
  0x2c   :  { %p806_p5 = scmp.ne.s32.totalorder %s25_s26, %s805_s25  ;;  %p811_p7 = scmp.lt.s32.totalorder %s805_s25, %s805_s25 }
  0x2e   :  { %p812_p8 = por %p811_p7, %p810_p6 }
  0x30   :  { %p813_p9 = pnand %p812_p8, %p806_p5 }
  0x32   :  { %816 = shalt.err (!%p813_p9)
}
  0x33   :  { %27 = dma.hbm_to_vmem [thread:$0]  %s1082_s0, 128, %s25_s26, [#allocation3]  }
  0x34   :  { %s896_s27 = smov [#allocation7]   ;;  %s897_s29 = smov [#allocation10]  }
  0x35   :  { %s47_s28 = sshll.u32 %s896_s27, 4  ;;  %s75_s30 = sshll.u32 %s897_s29, 4  ;;  %s48_s28 = int_to_ptr.vmem [resolvable:$true] %s47_s28  ;;  %s76_s30 = int_to_ptr.vmem [resolvable:$true] %s75_s30 }
  0x36   :  { %s817_s13 = scalar_lea.hbm %s1085_s3, 2048 }
  0x37   :  { %p818_p10 = scmp.ne.s32.totalorder %s1085_s3, %s817_s13  ;;  %p821_p11 = scmp.lt.u32.totalorder %s817_s13, %s1085_s3 }
  0x39   :  { %p823_p12 = pnand %p821_p11, %p818_p10 }
  0x3b   :  { %826 = shalt.err (!%p823_p12)
}
  0x3c   :  { %s827_s0 = scalar_lea.vmem %s48_s28, 2048  ;;  %p832_p0 = scmp.lt.s32.totalorder %s48_s28, %s48_s28 }
  0x3d   :  { %p828_p13 = scmp.ne.s32.totalorder %s48_s28, %s827_s0  ;;  %p833_p1 = scmp.lt.s32.totalorder %s827_s0, %s827_s0 }
  0x3f   :  { %p834_p2 = por %p833_p1, %p832_p0 }
  0x41   :  { %p835_p3 = pnand %p834_p2, %p828_p13 }
  0x43   :  { %838 = shalt.err (!%p835_p3)
}
  0x44   :  { %53 = dma.hbm_to_vmem [thread:$0]  %s1085_s3, 2048, %s48_s28, [#allocation6], %s892_s19, %s892_s19, %s893_s20  }
  0x45   :  { %s839_s21 = scalar_lea.hbm %s1089_s7, 2048 }
  0x46   :  { %p840_p4 = scmp.ne.s32.totalorder %s1089_s7, %s839_s21  ;;  %p843_p5 = scmp.lt.u32.totalorder %s839_s21, %s1089_s7 }
  0x48   :  { %p845_p6 = pnand %p843_p5, %p840_p4 }
  0x4a   :  { %848 = shalt.err (!%p845_p6)
}
  0x4b   :  { %s849_s24 = scalar_lea.vmem %s76_s30, 2048  ;;  %p854_p8 = scmp.lt.s32.totalorder %s76_s30, %s76_s30 }
  0x4c   :  { %p850_p7 = scmp.ne.s32.totalorder %s76_s30, %s849_s24  ;;  %p855_p9 = scmp.lt.s32.totalorder %s849_s24, %s849_s24 }
  0x4e   :  { %p856_p10 = por %p855_p9, %p854_p8 }
  0x50   :  { %p857_p11 = pnand %p856_p10, %p850_p7 }
  0x52   :  { %860 = shalt.err (!%p857_p11)
}
  0x53   :  { %81 = dma.hbm_to_vmem [thread:$0]  %s1089_s7, 2048, %s76_s30, [#allocation9], %s892_s19, %s892_s19, %s893_s20  }
  0x54   :  { %883 = dma.done.wait [#allocation3], 128  }
  0x55   :  { %884 = vsyncadd [#allocation3], 4294967168 }
  0x56   :  { %885 = dma.done.wait [#allocation6], 2560  }
  0x57   :  { %886 = vsyncadd [#allocation6], 4294964736 }
  0x58   :  { %887 = dma.done.wait [#allocation9], 4096  }
  0x59   :  { %888 = vsyncadd [#allocation9], 4294963200  ;;  %v898_v0 = vmov 0.0|0.0   ;;  %vm899_vm0 = vmmov 0   ;;  %v900_v1 = vmov 0.0   ;;  %v100_v2 = vld [vmem:[#allocation5] sm:$0xff] }
  0x5a   :  { %662 = vmatprep.subr.bf16.mxu0 %v898_v0  ;;  %554 = vmatprep.mubr.msk.f32.mxu0 %vm899_vm0, %v900_v1  ;;  %v101_v3 = vld [vmem:[#allocation5 + $0x8] sm:$0xff]  ;;  %v102_v4 = vld [vmem:[#allocation5 + $0x10] sm:$0xff]  ;;  %v103_v6 = vld [vmem:[#allocation5 + $0x18] sm:$0xff]  ;;  %vm111_vm1 = vcmask 261120   ;;  %s901_s11 = smov [#allocation11]  }
  0x5b   :  { %668 = vmatprep.subr.bf16.mxu1 %v898_v0  ;;  %589 = vmatprep.mubr.msk.f32.mxu1 %vm899_vm0, %v900_v1  ;;  %v663_v5 = vpack.c.bf16 %v101_v3, %v100_v2  ;;  %v186_v7 = vld [vmem:[#allocation7] sm:$0xff]  ;;  %v187_v8 = vld [vmem:[#allocation7 + $0x8] sm:$0xff]  ;;  %v188_v9 = vld [vmem:[#allocation7 + $0x10] sm:$0xff]  ;;  %v666_v11 = vpack.c.bf16 %v103_v6, %v102_v4  ;;  %s474_s12 = sshll.u32 %s901_s11, 4  ;;  %s475_s12 = int_to_ptr.vmem [resolvable:$true] %s474_s12 }
  0x5c   :  { %v189_v10 = vld [vmem:[#allocation7 + $0x18] sm:$0xff]  ;;  %v669_v12 = vpack.c.bf16 %v187_v8, %v186_v7  ;;  %v190_v14 = vld [vmem:[#allocation7 + $0x20] sm:$0xff]  ;;  %v191_v15 = vld [vmem:[#allocation7 + $0x28] sm:$0xff]  ;;  %s861_s13 = scalar_lea.vmem %s475_s12, 128  ;;  %p866_p13 = scmp.lt.s32.totalorder %s475_s12, %s475_s12 }
  0x5d   :  { %664 = vmatpush3.bf16.msra.mxu0 %v663_v5  ;;  %v672_v13 = vpack.c.bf16 %v189_v10, %v188_v9  ;;  %v99_v16 = vld [vmem:[#allocation2] sm:$0xff]  ;;  %v675_v17 = vpack.c.bf16 %v191_v15, %v190_v14  ;;  %v192_v18 = vld [vmem:[#allocation7 + $0x30] sm:$0xff]  ;;  %v194_v21 = vld [vmem:[#allocation7 + $0x40] sm:$0xff]  ;;  %p862_p12 = scmp.ne.s32.totalorder %s475_s12, %s861_s13  ;;  %p867_p0 = scmp.lt.s32.totalorder %s861_s13, %s861_s13 }
  0x5e   :  { %665 = vmatprep.subr.bf16.mxu0 %v898_v0  ;;  %670 = vmatpush3.bf16.msra.mxu1 %v669_v12  ;;  %v193_v19 = vld [vmem:[#allocation7 + $0x38] sm:$0xff]  ;;  %v195_v22 = vld [vmem:[#allocation7 + $0x48] sm:$0xff]  ;;  %v196_v24 = vld [vmem:[#allocation7 + $0x50] sm:$0xff] }
  0x5f   :  { %671 = vmatprep.subr.bf16.mxu1 %v898_v0  ;;  %v678_v20 = vpack.c.bf16 %v193_v19, %v192_v18  ;;  %v681_v23 = vpack.c.bf16 %v195_v22, %v194_v21  ;;  %v197_v25 = vld [vmem:[#allocation7 + $0x58] sm:$0xff]  ;;  %v198_v27 = vld [vmem:[#allocation7 + $0x60] sm:$0xff]  ;;  %v199_v28 = vld [vmem:[#allocation7 + $0x68] sm:$0xff]  ;;  %p868_p1 = por %p867_p0, %p866_p13 }
  0x60   :  { %v684_v26 = vpack.c.bf16 %v197_v25, %v196_v24  ;;  %v687_v29 = vpack.c.bf16 %v199_v28, %v198_v27  ;;  %v200_v30 = vld [vmem:[#allocation7 + $0x70] sm:$0xff]  ;;  %v201_v31 = vld [vmem:[#allocation7 + $0x78] sm:$0xff]  ;;  %v280_v33 = vld [vmem:[#allocation8] sm:$0xff] }
  0x61   :  { %667 = vmatpush3.bf16.msra.mxu0 %v666_v11  ;;  %v690_v32 = vpack.c.bf16 %v201_v31, %v200_v30  ;;  %v281_v34 = vld [vmem:[#allocation8 + $0x8] sm:$0xff]  ;;  %v282_v35 = vld [vmem:[#allocation8 + $0x10] sm:$0xff]  ;;  %v283_v37 = vld [vmem:[#allocation8 + $0x18] sm:$0xff]  ;;  %p869_p2 = pnand %p868_p1, %p862_p12 }
  0x62   :  { %692 = vmatprep.subr.bf16.mxu0 %v898_v0  ;;  %673 = vmatpush3.bf16.msra.mxu1 %v672_v13  ;;  %v693_v36 = vpack.c.bf16 %v281_v34, %v280_v33  ;;  %v696_v38 = vpack.c.bf16 %v283_v37, %v282_v35  ;;  %v284_v39 = vld [vmem:[#allocation8 + $0x20] sm:$0xff]  ;;  %v285_v40 = vld [vmem:[#allocation8 + $0x28] sm:$0xff]  ;;  %v286_v42 = vld [vmem:[#allocation8 + $0x30] sm:$0xff] }
  0x63   :  { %674 = vmatprep.subr.bf16.mxu1 %v898_v0  ;;  %v699_v41 = vpack.c.bf16 %v285_v40, %v284_v39  ;;  %v287_v43 = vld [vmem:[#allocation8 + $0x38] sm:$0xff]  ;;  %v288_v45 = vld [vmem:[#allocation8 + $0x40] sm:$0xff]  ;;  %v289_v46 = vld [vmem:[#allocation8 + $0x48] sm:$0xff] }
  0x64   :  { %555 = vmatmul.mubr.msk.f32.vlgmr.msra.gmra.mrb[0].mxu0 %vm111_vm1, %v99_v16  ;;  %v702_v44 = vpack.c.bf16 %v287_v43, %v286_v42  ;;  %v705_v47 = vpack.c.bf16 %v289_v46, %v288_v45  ;;  %v290_v48 = vld [vmem:[#allocation8 + $0x50] sm:$0xff]  ;;  %v291_v49 = vld [vmem:[#allocation8 + $0x58] sm:$0xff]  ;;  %v292_v51 = vld [vmem:[#allocation8 + $0x60] sm:$0xff] }
  0x65   :  { %624 = vmatprep.mubr.msk.f32.mxu0 %vm899_vm0, %v900_v1  ;;  %694 = vmatpush3.bf16.msra.mxu0 %v693_v36  ;;  %v708_v50 = vpack.c.bf16 %v291_v49, %v290_v48  ;;  %v293_v52 = vld [vmem:[#allocation8 + $0x68] sm:$0xff]  ;;  %v485_v54 = vld [vmem:[%s1084_s2] ss:$0 sm:$0xff]  ;;  %v294_v59 = vld [vmem:[#allocation8 + $0x70] sm:$0xff] }
  0x66   :  { %676 = vmatpush3.bf16.msra.mxu1 %v675_v17  ;;  %695 = vmatprep.subr.bf16.mxu0 %v898_v0  ;;  %v711_v53 = vpack.c.bf16 %v293_v52, %v292_v51  ;;  %v295_v60 = vld [vmem:[#allocation8 + $0x78] sm:$0xff]  ;;  %v374_v62 = vld [vmem:[#allocation10] sm:$0xff]  ;;  %v375_v63 = vld [vmem:[#allocation10 + $0x8] sm:$0xff] }
  0x67   :  { %677 = vmatprep.subr.bf16.mxu1 %v898_v0  ;;  %v714_v61 = vpack.c.bf16 %v295_v60, %v294_v59  ;;  %v376_v2 = vld [vmem:[#allocation10 + $0x10] sm:$0xff]  ;;  %v717_v3 = vpack.c.bf16 %v375_v63, %v374_v62  ;;  %v377_v4 = vld [vmem:[#allocation10 + $0x18] sm:$0xff]  ;;  %v378_v6 = vld [vmem:[#allocation10 + $0x20] sm:$0xff] }
  0x68   :  { %v720_v5 = vpack.c.bf16 %v377_v4, %v376_v2  ;;  %v379_v7 = vld [vmem:[#allocation10 + $0x28] sm:$0xff]  ;;  %v381_v9 = vld [vmem:[#allocation10 + $0x38] sm:$0xff]  ;;  %v382_v11 = vld [vmem:[#allocation10 + $0x40] sm:$0xff] }
  0x69   :  { %697 = vmatpush3.bf16.msra.mxu0 %v696_v38  ;;  %v723_v8 = vpack.c.bf16 %v379_v7, %v378_v6  ;;  %v383_v12 = vld [vmem:[#allocation10 + $0x48] sm:$0xff]  ;;  %v384_v14 = vld [vmem:[#allocation10 + $0x50] sm:$0xff]  ;;  %v385_v15 = vld [vmem:[#allocation10 + $0x58] sm:$0xff] }
  0x6a   :  { %679 = vmatpush3.bf16.msra.mxu1 %v678_v20  ;;  %698 = vmatprep.subr.bf16.mxu0 %v898_v0  ;;  %v729_v13 = vpack.c.bf16 %v383_v12, %v382_v11  ;;  %v732_v16 = vpack.c.bf16 %v385_v15, %v384_v14  ;;  %v386_v17 = vld [vmem:[#allocation10 + $0x60] sm:$0xff]  ;;  %v387_v18 = vld [vmem:[#allocation10 + $0x68] sm:$0xff]  ;;  %v487_v20 = vld [vmem:[%s1086_s4] ss:$0 sm:$0xff] }
  0x6b   :  { %680 = vmatprep.subr.bf16.mxu1 %v898_v0  ;;  %v735_v19 = vpack.c.bf16 %v387_v18, %v386_v17  ;;  %v388_v25 = vld [vmem:[#allocation10 + $0x70] sm:$0xff]  ;;  %v488_v28 = vld [vmem:[%s1088_s6] ss:$0 sm:$0xff] }
  0x6d   :  { %700 = vmatpush3.bf16.msra.mxu0 %v699_v41 }
  0x6e   :  { %682 = vmatpush3.bf16.msra.mxu1 %v681_v23  ;;  %701 = vmatprep.subr.bf16.mxu0 %v898_v0 }
  0x6f   :  { %683 = vmatprep.subr.bf16.mxu1 %v898_v0 }
  0x71   :  { %703 = vmatpush3.bf16.msra.mxu0 %v702_v44 }
  0x72   :  { %685 = vmatpush3.bf16.msra.mxu1 %v684_v26  ;;  %704 = vmatprep.subr.bf16.mxu0 %v898_v0  ;;  %v389_v26 = vld [vmem:[#allocation10 + $0x78] sm:$0xff] }
  0x73   :  { %686 = vmatprep.subr.bf16.mxu1 %v898_v0  ;;  %v738_v27 = vpack.c.bf16 %v389_v26, %v388_v25 }
  0x75   :  { %706 = vmatpush3.bf16.msra.mxu0 %v705_v47 }
  0x76   :  { %688 = vmatpush3.bf16.msra.mxu1 %v687_v29  ;;  %707 = vmatprep.subr.bf16.mxu0 %v898_v0 }
  0x77   :  { %689 = vmatprep.subr.bf16.mxu1 %v898_v0 }
  0x79   :  { %709 = vmatpush3.bf16.msra.mxu0 %v708_v50 }
  0x7a   :  { %691 = vmatpush3.bf16.msra.mxu1 %v690_v32  ;;  %710 = vmatprep.subr.bf16.mxu0 %v898_v0  ;;  %v489_v32 = vld [vmem:[%s1090_s8] ss:$0 sm:$0xff] }
  0x7b   :  { %716 = vmatprep.subr.bf16.mxu1 %v898_v0 }
  0x7d   :  { %712 = vmatpush3.bf16.msra.mxu0 %v711_v53 }
  0x7e   :  { %713 = vmatprep.subr.bf16.mxu0 %v898_v0 }
  0x81   :  { %715 = vmatpush3.bf16.msra.mxu0 %v714_v61 }
 0x137   :  { %v181_v55 = vpop.f32.mrb[0].mxu0 }
 0x138   :  { %v182_v56 = vadd.f32 %v485_v54, %v181_v55  ;;  %v556_v57 = vpop.f32.mrb[1].mxu0 }
 0x13a   :  { %v185_v58 = vmax.f32 %v182_v56, 0.0 }
 0x13c   :  { %590 = vmatmul.mubr.f32.vlgmr.msra.gmra.mrb[0].mxu1 %v185_v58 }
 0x13d   :  { %659 = vmatprep.mubr.msk.f32.mxu1 %vm899_vm0, %v900_v1  ;;  %718 = vmatpush3.bf16.msra.mxu1 %v717_v3  ;;  %v380_v1 = vld [vmem:[#allocation10 + $0x30] sm:$0xff] }
 0x13e   :  { %719 = vmatprep.subr.bf16.mxu1 %v898_v0  ;;  %v726_v10 = vpack.c.bf16 %v381_v9, %v380_v1 }
 0x141   :  { %721 = vmatpush3.bf16.msra.mxu1 %v720_v5 }
 0x142   :  { %722 = vmatprep.subr.bf16.mxu1 %v898_v0 }
 0x145   :  { %724 = vmatpush3.bf16.msra.mxu1 %v723_v8 }
 0x146   :  { %725 = vmatprep.subr.bf16.mxu1 %v898_v0 }
 0x149   :  { %727 = vmatpush3.bf16.msra.mxu1 %v726_v10 }
 0x14a   :  { %728 = vmatprep.subr.bf16.mxu1 %v898_v0 }
 0x14d   :  { %730 = vmatpush3.bf16.msra.mxu1 %v729_v13 }
 0x14e   :  { %731 = vmatprep.subr.bf16.mxu1 %v898_v0 }
 0x151   :  { %733 = vmatpush3.bf16.msra.mxu1 %v732_v16 }
 0x152   :  { %734 = vmatprep.subr.bf16.mxu1 %v898_v0 }
 0x155   :  { %736 = vmatpush3.bf16.msra.mxu1 %v735_v19 }
 0x156   :  { %737 = vmatprep.subr.bf16.mxu1 %v898_v0 }
 0x159   :  { %739 = vmatpush3.bf16.msra.mxu1 %v738_v27 }
 0x20f   :  { %v275_v21 = vpop.f32.mrb[0].mxu1 }
 0x210   :  { %v276_v22 = vadd.f32 %v487_v20, %v275_v21  ;;  %v591_v23 = vpop.f32.mrb[1].mxu1 }
 0x212   :  { %v279_v24 = vmax.f32 %v276_v22, 0.0 }
 0x214   :  { %625 = vmatmul.mubr.f32.vlgmr.msra.gmra.mrb[2].mxu0 %v279_v24 }
 0x2e7   :  { %v369_v29 = vpop.f32.mrb[2].mxu0 }
 0x2e8   :  { %v370_v30 = vadd.f32 %v488_v28, %v369_v29  ;;  %v626_v0 = vpop.f32.mrb[3].mxu0 }
 0x2ea   :  { %v373_v31 = vmax.f32 %v370_v30, 0.0 }
 0x2ec   :  { %660 = vmatmul.mubr.f32.vlgmr.msra.gmra.mrb[2].mxu1 %v373_v31 }
 0x3bf   :  { %v463_v33 = vpop.f32.mrb[2].mxu1 }
 0x3c0   :  { %v464_v34 = vadd.f32 %v489_v32, %v463_v33  ;;  %v661_v35 = vpop.f32.mrb[3].mxu1 }
 0x3c2   :  { %467 = vst [vmem:[#allocation11] sm:$0xff] %v464_v34 }
 0x3c3   :  { %872 = shalt.err (!%p869_p2)
}
 0x3c4   :  { %s873_s10 = scalar_lea.hbm %s1091_s9, 128 }
 0x3c5   :  { %p874_p3 = scmp.ne.s32.totalorder %s1091_s9, %s873_s10  ;;  %p877_p4 = scmp.lt.u32.totalorder %s873_s10, %s1091_s9 }
 0x3c7   :  { %p879_p5 = pnand %p877_p4, %p874_p3 }
 0x3c9   :  { %882 = shalt.err (!%p879_p5)
}
 0x3ca   :  { %477 = dma.vmem_to_hbm [thread:$0]  %s475_s12, 128, %s1091_s9, [#allocation4]  }
 0x3cb   :  { %889 = dma.done.wait [#allocation4], 128  }
 0x3cc   :  { %890 = vsyncadd [#allocation4], 4294967168 }
 0x3cd   :  { %481 = vsyncpa [#allocation3], 1 }
 0x3ce   :  { %482 = vsyncpa [#allocation6], 1 }
 0x3cf   :  { %483 = vsyncpa [#allocation9], 1 }
 0x3d0   :  { %484 = vsyncpa [#allocation4], 1 }

</bundles_post_ra>
